<compile_context>
chip_gen: v6e
topology: v6e:2x2x1
jax: 0.10.0
libtpu: 0.0.40
codegen_flags: <defaults>
</compile_context>

<pallas_src>
import functools
import math

import jax
import jax.numpy as jnp
from jax import lax
from jax.experimental import pallas as pl
from jax.experimental.pallas import tpu as pltpu


def _round_up(x: int, m: int) -> int:
    return (x + m - 1) // m * m


def _triplet_batch_hard_kernel(feat_row_ref, feat_col_ref, lab_a_ref, lab_c_ref,
                               o_ref, sp_ref, sn_ref,
                               *, margin: float, n: int, tm: int, tn: int,
                               padded: bool):
    i = pl.program_id(0)                 # row-tile index ('parallel')
    j = pl.program_id(1)                 # col-tile index ('arbitrary', innermost)
    last_j = pl.num_programs(1) - 1

    @pl.when(j == 0)
    def _init():
        sp_ref[...] = jnp.full_like(sp_ref, jnp.inf)    # min similarity over positives
        sn_ref[...] = jnp.full_like(sn_ref, -jnp.inf)   # max similarity over negatives

    # Gram tile on the MXU, contracting the feature dim of both operands
    # (no transpose materialized); operands are already normalized / cast.
    g = lax.dot_general(feat_row_ref[...], feat_col_ref[...],
                        dimension_numbers=(((1,), (1,)), ((), ())),
                        preferred_element_type=jnp.float32)       # (tm, tn) f32

    same = lab_a_ref[...] == lab_c_ref[...]                       # (tm, tn) bool

    row_lo = i * tm
    col_lo = j * tn
    # Only tiles overlapping the diagonal (and, with padding, tiles containing
    # padded columns) need the extra masks; everything else is the cheap path.
    special = jnp.logical_and(row_lo < col_lo + tn, col_lo < row_lo + tm)
    if padded:
        special = jnp.logical_or(special, col_lo + tn > n)

    @pl.when(jnp.logical_not(special))
    def _fast():
        # No self-match and no padded columns in this tile: masks are just
        # `same` / `~same` (the latter folded into the where's else-branch).
        sp_ref[...] = jnp.minimum(
            sp_ref[...],
            jnp.min(jnp.where(same, g, jnp.inf), axis=1, keepdims=True))
        sn_ref[...] = jnp.maximum(
            sn_ref[...],
            jnp.max(jnp.where(same, -jnp.inf, g), axis=1, keepdims=True))

    @pl.when(special)
    def _masked():
        row_g = row_lo + lax.broadcasted_iota(jnp.int32, (tm, 1), 0)
        col_g = col_lo + lax.broadcasted_iota(jnp.int32, (1, tn), 1)
        mask_pos = jnp.logical_and(same, row_g != col_g)    # exclude the anchor itself
        mask_neg = jnp.logical_not(same)
        if padded:
            # Padded labels are INT32_MIN so they never match a real label
            # (positives need no validity mask); negatives must drop them.
            mask_neg = jnp.logical_and(mask_neg, col_g < n)
        sp_ref[...] = jnp.minimum(
            sp_ref[...],
            jnp.min(jnp.where(mask_pos, g, jnp.inf), axis=1, keepdims=True))
        sn_ref[...] = jnp.maximum(
            sn_ref[...],
            jnp.max(jnp.where(mask_neg, g, -jnp.inf), axis=1, keepdims=True))

    @pl.when(j == last_j)
    def _finalize():
        sp = sp_ref[...]
        sn = sn_ref[...]
        # Unit-norm rows: d = sqrt(2 - 2 <xi, xj>); sqrt touches only the two
        # mined (tm, 1) columns.  sp == +inf (no positive) -> hp = -inf -> loss
        # 0; sn == -inf (no negative) -> hn = +inf -> loss 0 (both match the
        # reference semantics).
        hp = jnp.where(sp < jnp.inf,
                       jnp.sqrt(jnp.maximum(2.0 - 2.0 * sp, 0.0)), -jnp.inf)
        hn = jnp.sqrt(jnp.maximum(2.0 - 2.0 * sn, 0.0))
        loss = jnp.maximum(hp - hn + jnp.float32(margin), 0.0)
        if padded:
            row_g = row_lo + lax.broadcasted_iota(jnp.int32, (tm, 1), 0)
            loss = jnp.where(row_g < n, loss, 0.0)          # zero padded anchors
        o_ref[...] = loss


def _pick_tiles(n: int, big_vmem: bool):
    n128 = _round_up(n, 128)
    if n128 <= 1024:
        tn, n_pad = n128, n128                 # single column (reduction) tile
    else:
        tn, n_pad = 1024, _round_up(n, 1024)   # big reduction tile amortizes step overhead
    tm_cap = 512 if big_vmem else 256          # v5e/v6e: fewer column re-reads
    tm = tn
    while tm > tm_cap:
        tm //= 2                               # keeps tm | tn | n_pad
    if (not big_vmem) and n_pad // tm < 2 and tm >= 256:
        tm //= 2                               # v7x megacore: give core 1 a row block
    return tm, tn, n_pad


def triplet_loss_batch_hard(features: jax.Array, labels: jax.Array,
                            margin: float = 0.3, use_bf16_mxu: bool = True,
                            tile_m: int | None = None,
                            tile_n: int | None = None) -> jax.Array:
    """Pallas implementation of TripletLossWithBatchHard.forward.

    use_bf16_mxu=True feeds the Gram matmul with bf16 operands (f32
    accumulation); mined distances then carry ~1e-2 rounding (hard-example
    selection is comparison-based so this only matters for near ties).  Set
    False for bit-faithful f32 distances.
    """
    n, d = features.shape
    d_pad = _round_up(d, 128)
    mxu_dtype = jnp.bfloat16 if use_bf16_mxu else jnp.float32

    try:
        vmem_cap = int(pltpu.get_tpu_info().vmem_capacity_bytes)
    except Exception:
        vmem_cap = 64 * 1024 * 1024            # conservative (v7x-sized) default
    big_vmem = vmem_cap >= (96 << 20)          # v5e/v6e have 128 MiB per core

    if tile_m is not None or tile_n is not None:
        tm = int(tile_m or tile_n)
        tn = int(tile_n or tile_m)
        n_pad = _round_up(n, math.lcm(tm, tn))
    else:
        tm, tn, n_pad = _pick_tiles(n, big_vmem)

    # Normalize ONCE (f32, F.normalize clamp_min(1e-12) semantics), zero-pad
    # (padding changes neither norms nor the Gram matrix) and cast to the MXU
    # operand dtype.  The column stream is re-read n_pad//tm times, so the
    # bf16 pre-cast halves that HBM traffic and the kernel does no
    # normalization at all.
    f32 = features.astype(jnp.float32)
    norm = jnp.sqrt(jnp.sum(f32 * f32, axis=1, keepdims=True))
    feats = f32 / jnp.maximum(norm, 1e-12)
    if (n_pad, d_pad) != (n, d):
        feats = jnp.pad(feats, ((0, n_pad - n), (0, d_pad - d)))
    feats = feats.astype(mxu_dtype)

    sentinel = jnp.iinfo(jnp.int32).min        # never equals a real class label
    labs = labels.astype(jnp.int32)
    if n_pad != n:
        labs = jnp.pad(labs, (0, n_pad - n), constant_values=sentinel)
    lab_a = labs.reshape(n_pad, 1)             # anchor labels    (rows)
    lab_c = labs.reshape(1, n_pad)             # candidate labels (columns)

    padded = n_pad != n
    n_col_tiles = n_pad // tn
    deep_cols = n_col_tiles >= 4 and d_pad <= 512   # short per-step compute: hide DMA
    col_bufs = 3 if deep_cols else 2
    if deep_cols:
        col_spec = pl.BlockSpec((tn, d_pad), lambda i, j: (j, 0),
                                pipeline_mode=pl.Buffered(3))
    else:
        col_spec = pl.BlockSpec((tn, d_pad), lambda i, j: (j, 0))

    # Scoped-VMEM budget from the tiles (usage is O(tm*tn)); capped with
    # headroom below the physical VMEM of the current generation.
    feat_bytes = jnp.dtype(mxu_dtype).itemsize
    est = ((2 * tm + col_bufs * tn) * d_pad * feat_bytes   # buffered feature tiles
           + 10 * tm * tn * 4                              # (tm, tn) f32/bool temporaries
           + 16 * (tm + tn) * 4)                           # labels / accumulators / output
    vmem_limit = int(min(max(2 * est, 32 << 20), (vmem_cap * 3) // 4))

    kernel = functools.partial(_triplet_batch_hard_kernel, margin=float(margin),
                               n=n, tm=tm, tn=tn, padded=padded)

    loss_rows = pl.pallas_call(
        kernel,
        out_shape=jax.ShapeDtypeStruct((n_pad, 1), jnp.float32),
        grid_spec=pltpu.PrefetchScalarGridSpec(
            num_scalar_prefetch=0,
            grid=(n_pad // tm, n_pad // tn),
            in_specs=[
                pl.BlockSpec((tm, d_pad), lambda i, j: (i, 0)),  # anchor rows (resident over j)
                col_spec,                                        # candidate columns
                pl.BlockSpec((tm, 1), lambda i, j: (i, 0)),      # anchor labels
                pl.BlockSpec((1, tn), lambda i, j: (0, j)),      # candidate labels
            ],
            out_specs=pl.BlockSpec((tm, 1), lambda i, j: (i, 0)),
            scratch_shapes=[
                pltpu.VMEM((tm, 1), jnp.float32),   # running min similarity (positives)
                pltpu.VMEM((tm, 1), jnp.float32),   # running max similarity (negatives)
            ],
        ),
        compiler_params=pltpu.CompilerParams(
            dimension_semantics=("parallel", "arbitrary"),
            vmem_limit_bytes=vmem_limit,
        ),
    )(feats, feats, lab_a, lab_c)

    # Padded anchors are zeroed in-kernel; the mean over the N real anchors is
    # one tiny reduction here because the row grid axis is core-parallel.
    return jnp.sum(loss_rows) / jnp.float32(n)


def _reference(features, labels, margin=0.3):
    """Pure-JAX reference mirroring the PyTorch module."""
    f = features.astype(jnp.float32)
    f = f / jnp.maximum(jnp.linalg.norm(f, axis=1, keepdims=True), 1e-12)
    d2 = jnp.sum((f[:, None, :] - f[None, :, :]) ** 2, axis=-1)
    dist = jnp.sqrt(jnp.maximum(d2, 0.0))
    same = labels[:, None] == labels[None, :]
    eye = jnp.eye(f.shape[0], dtype=bool)
    hp = jnp.max(jnp.where(same & ~eye, dist, -jnp.inf), axis=1)
    hn = jnp.min(jnp.where(~same, dist, jnp.inf), axis=1)
    return jnp.mean(jnp.maximum(hp - hn + margin, 0.0))


if __name__ == "__main__":
    key = jax.random.PRNGKey(0)
    k1, k2, k3, k4, k5, k6 = jax.random.split(key, 6)

    # --- case 1: small, aligned batch; f32 MXU path (tight tolerance) ---
    f1 = jax.random.normal(k1, (8, 32), dtype=jnp.float32)
    l1 = jnp.array([0, 0, 1, 1, 2, 2, 3, 3], dtype=jnp.int32)
    r1 = _reference(f1, l1, margin=0.3)
    o1 = triplet_loss_batch_hard(f1, l1, margin=0.3, use_bf16_mxu=False)
    jax.block_until_ready(o1)
    assert jnp.allclose(o1, r1, atol=1e-4, rtol=1e-4), (o1, r1)

    # --- case 2: ragged N / D exercising the padded-row / padded-column masks ---
    f2 = jax.random.normal(k2, (10, 48), dtype=jnp.float32)
    l2 = jnp.array([0, 0, 1, 1, 2, 2, 3, 3, 4, 4], dtype=jnp.int32)
    r2 = _reference(f2, l2, margin=0.3)
    o2 = triplet_loss_batch_hard(f2, l2, margin=0.3, use_bf16_mxu=False)
    jax.block_until_ready(o2)
    assert jnp.allclose(o2, r2, atol=1e-4, rtol=1e-4), (o2, r2)

    # --- case 3: forced 128x128 tiles -> 3x3 grid: exercises the cheap
    # off-diagonal path, the diagonal (eye) path and the padded last column
    # tile in one run (f32 for a tight check of the mining logic) ---
    f3 = jax.random.normal(k3, (300, 64), dtype=jnp.float32)
    l3 = jax.random.randint(k4, (300,), 0, 12, dtype=jnp.int32)
    r3 = _reference(f3, l3, margin=0.3)
    o3 = triplet_loss_batch_hard(f3, l3, margin=0.3, use_bf16_mxu=False,
                                 tile_m=128, tile_n=128)
    jax.block_until_ready(o3)
    assert jnp.allclose(o3, r3, atol=1e-4, rtol=1e-4), (o3, r3)

    # --- case 4: auto (generation-aware) tiling with the bf16 MXU fast path ---
    f4 = jax.random.normal(k5, (512, 64), dtype=jnp.float32)
    l4 = jax.random.randint(k6, (512,), 0, 16, dtype=jnp.int32)
    r4 = _reference(f4, l4, margin=0.3)
    o4 = triplet_loss_batch_hard(f4, l4, margin=0.3, use_bf16_mxu=True)
    jax.block_until_ready(o4)
    assert jnp.allclose(o4, r4, atol=3e-2, rtol=3e-2), (o4, r4)

    print("KERNEL_OK")
</pallas_src>

<mosaic_0001>
module attributes {stable_mosaic.version = 11 : i64} {
  func.func @_triplet_batch_hard_kernel(%arg0: i32, %arg1: i32, %arg2: memref<128x128xf32, #tpu.memory_space<vmem>>, %arg3: memref<128x128xf32, #tpu.memory_space<vmem>>, %arg4: memref<128x1xi32, #tpu.memory_space<vmem>>, %arg5: memref<1x128xi32, #tpu.memory_space<vmem>>, %arg6: memref<128x1xf32, #tpu.memory_space<vmem>>, %arg7: memref<128x1xf32, #tpu.memory_space<vmem>>, %arg8: memref<128x1xf32, #tpu.memory_space<vmem>>) attributes {dimension_semantics = [#tpu.dimension_semantics<parallel>, #tpu.dimension_semantics<arbitrary>], iteration_bounds = array<i64: 1, 1>, scalar_prefetch = 0 : i64, scratch_operands = 2 : i64, tpu.core_type = #tpu.core_type<tc>, window_params = [{transform_indices = @transform_0, window_bounds = array<i64: 128, 128>}, {transform_indices = @transform_1, window_bounds = array<i64: 128, 128>}, {transform_indices = @transform_2, window_bounds = array<i64: 128, 1>}, {transform_indices = @transform_3, window_bounds = array<i64: 1, 128>}, {transform_indices = @transform_4, window_bounds = array<i64: 128, 1>}]} {
    %c0_i32 = arith.constant 0 : i32
    %0 = arith.cmpi eq, %arg1, %c0_i32 : i32
    %1 = arith.extui %0 : i1 to i32
    %c0_i32_0 = arith.constant 0 : i32
    %2 = arith.cmpi ne, %1, %c0_i32_0 : i32
    scf.if %2 {
      %cst_16 = arith.constant 0x7F800000 : f32
      %29 = vector.broadcast %cst_16 : f32 to vector<128x1xf32>
      %c0_17 = arith.constant 0 : index
      %c0_18 = arith.constant 0 : index
      %30 = vector.load %arg7[%c0_17, %c0_18] : memref<128x1xf32, #tpu.memory_space<vmem>>, vector<128x1xf32>
      tpu.vector_store %arg7[%c0_17, %c0_18], %29 {strides = array<i32>} : memref<128x1xf32, #tpu.memory_space<vmem>>, vector<128x1xf32>,
      %cst_19 = arith.constant 0xFF800000 : f32
      %31 = vector.broadcast %cst_19 : f32 to vector<128x1xf32>
      %c0_20 = arith.constant 0 : index
      %c0_21 = arith.constant 0 : index
      %32 = vector.load %arg8[%c0_20, %c0_21] : memref<128x1xf32, #tpu.memory_space<vmem>>, vector<128x1xf32>
      tpu.vector_store %arg8[%c0_20, %c0_21], %31 {strides = array<i32>} : memref<128x1xf32, #tpu.memory_space<vmem>>, vector<128x1xf32>,
    } else {
    }
    %c0 = arith.constant 0 : index
    %c0_1 = arith.constant 0 : index
    %3 = vector.load %arg2[%c0, %c0_1] : memref<128x128xf32, #tpu.memory_space<vmem>>, vector<128x128xf32>
    %c0_2 = arith.constant 0 : index
    %c0_3 = arith.constant 0 : index
    %4 = vector.load %arg3[%c0_2, %c0_3] : memref<128x128xf32, #tpu.memory_space<vmem>>, vector<128x128xf32>
    %cst = arith.constant dense<0.000000e+00> : vector<128x128xf32>
    %5 = tpu.matmul %3, %4, %cst {dimension_numbers = #tpu.dot_dimension_numbers<[1], [1], [0], [0], [0, 0, 1, 0], [], []>} : vector<128x128xf32>, vector<128x128xf32>, vector<128x128xf32> -> vector<128x128xf32>
    %c0_4 = arith.constant 0 : index
    %c0_5 = arith.constant 0 : index
    %6 = vector.load %arg4[%c0_4, %c0_5] : memref<128x1xi32, #tpu.memory_space<vmem>>, vector<128x1xi32>
    %c0_6 = arith.constant 0 : index
    %c0_7 = arith.constant 0 : index
    %7 = vector.load %arg5[%c0_6, %c0_7] : memref<1x128xi32, #tpu.memory_space<vmem>>, vector<1x128xi32>
    %8 = vector.broadcast %6 : vector<128x1xi32> to vector<128x128xi32>
    %9 = vector.broadcast %7 : vector<1x128xi32> to vector<128x128xi32>
    %10 = arith.cmpi eq, %8, %9 : vector<128x128xi32>
    %c128_i32 = arith.constant 128 : i32
    %11 = arith.muli %arg0, %c128_i32 : i32
    %c128_i32_8 = arith.constant 128 : i32
    %12 = arith.muli %arg1, %c128_i32_8 : i32
    %c128_i32_9 = arith.constant 128 : i32
    %13 = arith.addi %12, %c128_i32_9 : i32
    %14 = arith.cmpi slt, %11, %13 : i32
    %c128_i32_10 = arith.constant 128 : i32
    %15 = arith.addi %11, %c128_i32_10 : i32
    %16 = arith.cmpi slt, %12, %15 : i32
    %17 = arith.andi %14, %16 : i1
    %c128_i32_11 = arith.constant 128 : i32
    %18 = arith.addi %12, %c128_i32_11 : i32
    %c8_i32 = arith.constant 8 : i32
    %19 = arith.cmpi sgt, %18, %c8_i32 : i32
    %20 = arith.ori %17, %19 : i1
    %true = arith.constant true
    %21 = arith.xori %20, %true : i1
    %22 = arith.extui %21 : i1 to i32
    %c0_i32_12 = arith.constant 0 : i32
    %23 = arith.cmpi ne, %22, %c0_i32_12 : i32
    scf.if %23 {
      %c0_16 = arith.constant 0 : index
      %c0_17 = arith.constant 0 : index
      %29 = vector.load %arg7[%c0_16, %c0_17] : memref<128x1xf32, #tpu.memory_space<vmem>>, vector<128x1xf32>
      %cst_18 = arith.constant 0x7F800000 : f32
      %30 = vector.broadcast %cst_18 : f32 to vector<128x128xf32>
      %31 = arith.select %10, %5, %30 : vector<128x128xi1>, vector<128x128xf32>
      %cst_19 = arith.constant dense<0x7F800000> : vector<128xf32>
      %32 = vector.multi_reduction <minimumf>, %31, %cst_19 [1] : vector<128x128xf32> to vector<128xf32>
      %33 = vector.shape_cast %32 : vector<128xf32> to vector<128x1xf32>
      %34 = arith.minimumf %29, %33 : vector<128x1xf32>
      %c0_20 = arith.constant 0 : index
      %c0_21 = arith.constant 0 : index
      %35 = vector.load %arg7[%c0_20, %c0_21] : memref<128x1xf32, #tpu.memory_space<vmem>>, vector<128x1xf32>
      tpu.vector_store %arg7[%c0_20, %c0_21], %34 {strides = array<i32>} : memref<128x1xf32, #tpu.memory_space<vmem>>, vector<128x1xf32>,
      %c0_22 = arith.constant 0 : index
      %c0_23 = arith.constant 0 : index
      %36 = vector.load %arg8[%c0_22, %c0_23] : memref<128x1xf32, #tpu.memory_space<vmem>>, vector<128x1xf32>
      %cst_24 = arith.constant 0xFF800000 : f32
      %37 = vector.broadcast %cst_24 : f32 to vector<128x128xf32>
      %38 = arith.select %10, %37, %5 : vector<128x128xi1>, vector<128x128xf32>
      %cst_25 = arith.constant dense<0xFF800000> : vector<128xf32>
      %39 = vector.multi_reduction <maximumf>, %38, %cst_25 [1] : vector<128x128xf32> to vector<128xf32>
      %40 = vector.shape_cast %39 : vector<128xf32> to vector<128x1xf32>
      %41 = arith.maximumf %36, %40 : vector<128x1xf32>
      %c0_26 = arith.constant 0 : index
      %c0_27 = arith.constant 0 : index
      %42 = vector.load %arg8[%c0_26, %c0_27] : memref<128x1xf32, #tpu.memory_space<vmem>>, vector<128x1xf32>
      tpu.vector_store %arg8[%c0_26, %c0_27], %41 {strides = array<i32>} : memref<128x1xf32, #tpu.memory_space<vmem>>, vector<128x1xf32>,
    } else {
    }
    %24 = arith.extui %20 : i1 to i32
    %c0_i32_13 = arith.constant 0 : i32
    %25 = arith.cmpi ne, %24, %c0_i32_13 : i32
    scf.if %25 {
      %29 = tpu.iota {dimensions = array<i32: 0>} : vector<128x1xi32>
      %30 = vector.broadcast %11 : i32 to vector<128x1xi32>
      %31 = arith.addi %30, %29 : vector<128x1xi32>
      %32 = tpu.iota {dimensions = array<i32: 1>} : vector<1x128xi32>
      %33 = vector.broadcast %12 : i32 to vector<1x128xi32>
      %34 = arith.addi %33, %32 : vector<1x128xi32>
      %35 = vector.broadcast %31 : vector<128x1xi32> to vector<128x128xi32>
      %36 = vector.broadcast %34 : vector<1x128xi32> to vector<128x128xi32>
      %37 = arith.cmpi ne, %35, %36 : vector<128x128xi32>
      %38 = arith.andi %10, %37 : vector<128x128xi1>
      %cst_16 = arith.constant dense<true> : vector<128x128xi1>
      %39 = arith.xori %10, %cst_16 : vector<128x128xi1>
      %c8_i32_17 = arith.constant 8 : i32
      %40 = vector.broadcast %c8_i32_17 : i32 to vector<1x128xi32>
      %41 = arith.cmpi slt, %34, %40 : vector<1x128xi32>
      %42 = vector.broadcast %41 : vector<1x128xi1> to vector<128x128xi1>
      %43 = arith.andi %39, %42 : vector<128x128xi1>
      %c0_18 = arith.constant 0 : index
      %c0_19 = arith.constant 0 : index
      %44 = vector.load %arg7[%c0_18, %c0_19] : memref<128x1xf32, #tpu.memory_space<vmem>>, vector<128x1xf32>
      %cst_20 = arith.constant 0x7F800000 : f32
      %45 = vector.broadcast %cst_20 : f32 to vector<128x128xf32>
      %46 = arith.select %38, %5, %45 : vector<128x128xi1>, vector<128x128xf32>
      %cst_21 = arith.constant dense<0x7F800000> : vector<128xf32>
      %47 = vector.multi_reduction <minimumf>, %46, %cst_21 [1] : vector<128x128xf32> to vector<128xf32>
      %48 = vector.shape_cast %47 : vector<128xf32> to vector<128x1xf32>
      %49 = arith.minimumf %44, %48 : vector<128x1xf32>
      %c0_22 = arith.constant 0 : index
      %c0_23 = arith.constant 0 : index
      %50 = vector.load %arg7[%c0_22, %c0_23] : memref<128x1xf32, #tpu.memory_space<vmem>>, vector<128x1xf32>
      tpu.vector_store %arg7[%c0_22, %c0_23], %49 {strides = array<i32>} : memref<128x1xf32, #tpu.memory_space<vmem>>, vector<128x1xf32>,
      %c0_24 = arith.constant 0 : index
      %c0_25 = arith.constant 0 : index
      %51 = vector.load %arg8[%c0_24, %c0_25] : memref<128x1xf32, #tpu.memory_space<vmem>>, vector<128x1xf32>
      %cst_26 = arith.constant 0xFF800000 : f32
      %52 = vector.broadcast %cst_26 : f32 to vector<128x128xf32>
      %53 = arith.select %43, %5, %52 : vector<128x128xi1>, vector<128x128xf32>
      %cst_27 = arith.constant dense<0xFF800000> : vector<128xf32>
      %54 = vector.multi_reduction <maximumf>, %53, %cst_27 [1] : vector<128x128xf32> to vector<128xf32>
      %55 = vector.shape_cast %54 : vector<128xf32> to vector<128x1xf32>
      %56 = arith.maximumf %51, %55 : vector<128x1xf32>
      %c0_28 = arith.constant 0 : index
      %c0_29 = arith.constant 0 : index
      %57 = vector.load %arg8[%c0_28, %c0_29] : memref<128x1xf32, #tpu.memory_space<vmem>>, vector<128x1xf32>
      tpu.vector_store %arg8[%c0_28, %c0_29], %56 {strides = array<i32>} : memref<128x1xf32, #tpu.memory_space<vmem>>, vector<128x1xf32>,
    } else {
    }
    %c0_i32_14 = arith.constant 0 : i32
    %26 = arith.cmpi eq, %arg1, %c0_i32_14 : i32
    %27 = arith.extui %26 : i1 to i32
    %c0_i32_15 = arith.constant 0 : i32
    %28 = arith.cmpi ne, %27, %c0_i32_15 : i32
    scf.if %28 {
      %c0_16 = arith.constant 0 : index
      %c0_17 = arith.constant 0 : index
      %29 = vector.load %arg7[%c0_16, %c0_17] : memref<128x1xf32, #tpu.memory_space<vmem>>, vector<128x1xf32>
      %c0_18 = arith.constant 0 : index
      %c0_19 = arith.constant 0 : index
      %30 = vector.load %arg8[%c0_18, %c0_19] : memref<128x1xf32, #tpu.memory_space<vmem>>, vector<128x1xf32>
      %cst_20 = arith.constant 0x7F800000 : f32
      %31 = vector.broadcast %cst_20 : f32 to vector<128x1xf32>
      %32 = arith.cmpf olt, %29, %31 : vector<128x1xf32>
      %cst_21 = arith.constant 2.000000e+00 : f32
      %33 = vector.broadcast %cst_21 : f32 to vector<128x1xf32>
      %34 = arith.mulf %33, %29 : vector<128x1xf32>
      %cst_22 = arith.constant 2.000000e+00 : f32
      %35 = vector.broadcast %cst_22 : f32 to vector<128x1xf32>
      %36 = arith.subf %35, %34 : vector<128x1xf32>
      %cst_23 = arith.constant 0.000000e+00 : f32
      %37 = vector.broadcast %cst_23 : f32 to vector<128x1xf32>
      %38 = arith.maximumf %36, %37 : vector<128x1xf32>
      %39 = math.sqrt %38 : vector<128x1xf32>
      %cst_24 = arith.constant 0xFF800000 : f32
      %40 = vector.broadcast %cst_24 : f32 to vector<128x1xf32>
      %41 = arith.select %32, %39, %40 : vector<128x1xi1>, vector<128x1xf32>
      %cst_25 = arith.constant 2.000000e+00 : f32
      %42 = vector.broadcast %cst_25 : f32 to vector<128x1xf32>
      %43 = arith.mulf %42, %30 : vector<128x1xf32>
      %cst_26 = arith.constant 2.000000e+00 : f32
      %44 = vector.broadcast %cst_26 : f32 to vector<128x1xf32>
      %45 = arith.subf %44, %43 : vector<128x1xf32>
      %cst_27 = arith.constant 0.000000e+00 : f32
      %46 = vector.broadcast %cst_27 : f32 to vector<128x1xf32>
      %47 = arith.maximumf %45, %46 : vector<128x1xf32>
      %48 = math.sqrt %47 : vector<128x1xf32>
      %49 = arith.subf %41, %48 : vector<128x1xf32>
      %cst_28 = arith.constant 3.000000e-01 : f32
      %50 = vector.broadcast %cst_28 : f32 to vector<128x1xf32>
      %51 = arith.addf %49, %50 : vector<128x1xf32>
      %cst_29 = arith.constant 0.000000e+00 : f32
      %52 = vector.broadcast %cst_29 : f32 to vector<128x1xf32>
      %53 = arith.maximumf %51, %52 : vector<128x1xf32>
      %54 = tpu.iota {dimensions = array<i32: 0>} : vector<128x1xi32>
      %55 = vector.broadcast %11 : i32 to vector<128x1xi32>
      %56 = arith.addi %55, %54 : vector<128x1xi32>
      %c8_i32_30 = arith.constant 8 : i32
      %57 = vector.broadcast %c8_i32_30 : i32 to vector<128x1xi32>
      %58 = arith.cmpi slt, %56, %57 : vector<128x1xi32>
      %cst_31 = arith.constant 0.000000e+00 : f32
      %59 = vector.broadcast %cst_31 : f32 to vector<128x1xf32>
      %60 = arith.select %58, %53, %59 : vector<128x1xi1>, vector<128x1xf32>
      %c0_32 = arith.constant 0 : index
      %c0_33 = arith.constant 0 : index
      %61 = vector.load %arg6[%c0_32, %c0_33] : memref<128x1xf32, #tpu.memory_space<vmem>>, vector<128x1xf32>
      tpu.vector_store %arg6[%c0_32, %c0_33], %60 {strides = array<i32>} : memref<128x1xf32, #tpu.memory_space<vmem>>, vector<128x1xf32>,
    } else {
    }
    return
  }
  func.func @transform_0(%arg0: i32, %arg1: i32) -> (i32, i32) {
    %c0_i32 = arith.constant 0 : i32
    %c0_i32_0 = arith.constant 0 : i32
    return %arg0, %c0_i32 : i32, i32
  }
  func.func @transform_1(%arg0: i32, %arg1: i32) -> (i32, i32) {
    %c0_i32 = arith.constant 0 : i32
    %c0_i32_0 = arith.constant 0 : i32
    return %arg1, %c0_i32 : i32, i32
  }
  func.func @transform_2(%arg0: i32, %arg1: i32) -> (i32, i32) {
    %c0_i32 = arith.constant 0 : i32
    %c0_i32_0 = arith.constant 0 : i32
    return %arg0, %c0_i32 : i32, i32
  }
  func.func @transform_3(%arg0: i32, %arg1: i32) -> (i32, i32) {
    %c0_i32 = arith.constant 0 : i32
    %c0_i32_0 = arith.constant 0 : i32
    return %c0_i32, %arg1 : i32, i32
  }
  func.func @transform_4(%arg0: i32, %arg1: i32) -> (i32, i32) {
    %c0_i32 = arith.constant 0 : i32
    %c0_i32_0 = arith.constant 0 : i32
    return %arg0, %c0_i32 : i32, i32
  }
}

</mosaic_0001>

<bundles_post_ra>
// kernel: tpu_custom_call.1
= control target key start
LH: loop header
LB: loop body
LE: loop exit
PB: predicated region body
PF: predicated region fallthrough
CT: control target
= control target key end

     0   :  { %9 = vsyncpa [#allocation5], 0  ;;  %s1517_s15 = smov [#allocation4]   ;;  %s2037_s0 = inlined_call_operand.vmem [shape: f32[128,128], index: 0, kind: input, shape index: {}]   ;;  %s2038_s1 = inlined_call_operand.hbm [shape: f32[128,128], index: 1, kind: input, shape index: {}]   ;;  %s2039_s2 = inlined_call_operand.vmem [shape: s32[128,1], index: 2, kind: input, shape index: {}]   ;;  %s2040_s3 = inlined_call_operand.vmem [shape: s32[1,128], index: 3, kind: input, shape index: {}]   ;;  %s2041_s4 = inlined_call_operand.vmem [shape: f32[128,1], index: 4, kind: output, shape index: {}]  }
   0x1   :  { %s17_s16 = sshll.u32 %s1517_s15, 4  ;;  %s18_s16 = int_to_ptr.vmem [resolvable:$true] %s17_s16 }
   0x2   :  { %s1503_s17 = scalar_lea.vmem %s18_s16, 2048  ;;  %p1508_p1 = scmp.lt.s32.totalorder %s18_s16, %s18_s16 }
   0x3   :  { %p1504_p0 = scmp.ne.s32.totalorder %s18_s16, %s1503_s17  ;;  %p1509_p2 = scmp.lt.s32.totalorder %s1503_s17, %s1503_s17 }
   0x5   :  { %p1510_p3 = por %p1509_p2, %p1508_p1 }
   0x7   :  { %p1511_p4 = pnand %p1510_p3, %p1504_p0 }
   0x9   :  { %1514 = shalt.err (!%p1511_p4)
}
   0xa   :  { %s1518_s18 = smov 128   ;;  %s1519_s19 = smov 8  }
   0xb   :  { %23 = dma.hbm_to_vmem [thread:$0]  %s2038_s1, 2048, %s18_s16, [#allocation5], %s1518_s18, %s1518_s18, %s1519_s19  }
   0xc   :  { %1515 = dma.done.wait [#allocation5], 2048  }
   0xd   :  { %1516 = vsyncadd [#allocation5], 4294965248  ;;  %vm35_vm0 = vcmask 7168   ;;  %v1520_v0 = vmov 0.0   ;;  %v1521_v1 = vmov 0   ;;  %v99_v2 = vld [vmem:[#allocation4 + $0x78] sm:$0xff]  ;;  %v343_v56 = vlaneseq }
   0xe   :  { %1340 = vst.msk [vmem:[%s2041_s4 + $0x8] sm:$0xff] %vm35_vm0, %v1520_v0  ;;  %1341 = vst.msk [vmem:[%s2041_s4 + $0x10] sm:$0xff] %vm35_vm0, %v1520_v0  ;;  %1490 = vset.pattern.permute.xlu1 %v1521_v1  ;;  %1489 = vset.pattern.permute.xlu0 %v1521_v1  ;;  %v98_v3 = vld [vmem:[#allocation4 + $0x70] sm:$0xff]  ;;  %v97_v4 = vld [vmem:[#allocation4 + $0x68] sm:$0xff]  ;;  %v1522_v50 = vmov inf   ;;  %vm1523_vm4 = vmmov 1  }
   0xf   :  { %1342 = vst.msk [vmem:[%s2041_s4 + $0x18] sm:$0xff] %vm35_vm0, %v1520_v0  ;;  %1343 = vst.msk [vmem:[%s2041_s4 + $0x20] sm:$0xff] %vm35_vm0, %v1520_v0  ;;  %1393 = vmatprep.subr.mxu0 %v99_v2  ;;  %1449 = vmatprep.subr.mxu1 %v99_v2  ;;  %v68_v5 = vld [vmem:[%s2037_s0] sm:$0xff]  ;;  %v247_v8 = vld [vmem:[%s2039_s2 + $0x10] sm:$0xff]  ;;  %v1735_v58 = vshrl.u32 %v343_v56, 7  ;;  %v1746_v63 = vand.u32 127, %v343_v56 }
  0x10   :  { %1344 = vst.msk [vmem:[%s2041_s4 + $0x28] sm:$0xff] %vm35_vm0, %v1520_v0  ;;  %1345 = vst.msk [vmem:[%s2041_s4 + $0x30] sm:$0xff] %vm35_vm0, %v1520_v0  ;;  %1394 = vmatpush3.xpose.msra.mxu0 %v99_v2  ;;  %1465 = vmatpush3.xpose.msra.mxu1 %v99_v2  ;;  %v76_v6 = vld [vmem:[%s2037_s0 + $0x40] sm:$0xff]  ;;  %v95_v10 = vld [vmem:[#allocation4 + $0x58] sm:$0xff] }
  0x11   :  { %1346 = vst.msk [vmem:[%s2041_s4 + $0x38] sm:$0xff] %vm35_vm0, %v1520_v0  ;;  %1347 = vst.msk [vmem:[%s2041_s4 + $0x40] sm:$0xff] %vm35_vm0, %v1520_v0  ;;  %1395 = vmatprep.subr.mxu0 %v98_v3  ;;  %1450 = vmatprep.subr.mxu1 %v98_v3  ;;  %v96_v7 = vld [vmem:[#allocation4 + $0x60] sm:$0xff]  ;;  %v248_v11 = vld [vmem:[%s2039_s2 + $0x18] sm:$0xff]  ;;  %v345_v60 = vadd.s32 8, %v1735_v58  ;;  %v353_v62 = vadd.s32 72, %v1735_v58 }
  0x12   :  { %1348 = vst.msk [vmem:[%s2041_s4 + $0x48] sm:$0xff] %vm35_vm0, %v1520_v0  ;;  %1349 = vst.msk [vmem:[%s2041_s4 + $0x50] sm:$0xff] %vm35_vm0, %v1520_v0  ;;  %1425 = vmatprep.mubr.f32.mxu0 %v68_v5  ;;  %1437 = vmatprep.mubr.f32.mxu1 %v76_v6  ;;  %v245_v9 = vld [vmem:[%s2039_s2] sm:$0xff]  ;;  %v246_v12 = vld [vmem:[%s2039_s2 + $0x8] sm:$0xff]  ;;  %vm429_vm11 = vcmp.lt.s32.totalorder %v1746_v63, 8  ;;  %v359_v56 = vadd.s32 120, %v1735_v58 }
  0x13   :  { %1350 = vst.msk [vmem:[%s2041_s4 + $0x58] sm:$0xff] %vm35_vm0, %v1520_v0  ;;  %1351 = vst.msk [vmem:[%s2041_s4 + $0x60] sm:$0xff] %vm35_vm0, %v1520_v0  ;;  %269 = vperm.xlu1 %1490, %v247_v8   ;;  %263 = vperm.xlu0 %1489, %v245_v9   ;;  %v94_v13 = vld [vmem:[#allocation4 + $0x50] sm:$0xff]  ;;  %v250_v14 = vld [vmem:[%s2039_s2 + $0x28] sm:$0xff]  ;;  %vm382_vm3 = vcmp.ne.s32.totalorder %v345_v60, %v1746_v63  ;;  %vm390_vm7 = vcmp.ne.s32.totalorder %v353_v62, %v1746_v63 }
  0x14   :  { %1352 = vst.msk [vmem:[%s2041_s4 + $0x68] sm:$0xff] %vm35_vm0, %v1520_v0  ;;  %1353 = vst.msk [vmem:[%s2041_s4 + $0x70] sm:$0xff] %vm35_vm0, %v1520_v0  ;;  %1396 = vmatpush3.xpose.msra.mxu0 %v98_v3  ;;  %1466 = vmatpush3.xpose.msra.mxu1 %v98_v3  ;;  %v249_v15 = vld [vmem:[%s2039_s2 + $0x20] sm:$0xff]  ;;  %v93_v16 = vld [vmem:[#allocation4 + $0x48] sm:$0xff] }
  0x15   :  { %1354 = vst.msk [vmem:[%s2041_s4 + $0x78] sm:$0xff] %vm35_vm0, %v1520_v0  ;;  %1397 = vmatprep.subr.mxu0 %v97_v4  ;;  %1451 = vmatprep.subr.mxu1 %v97_v4  ;;  %v252_v17 = vld [vmem:[%s2039_s2 + $0x38] sm:$0xff]  ;;  %v251_v18 = vld [vmem:[%s2039_s2 + $0x30] sm:$0xff]  ;;  %v92_v19 = vld [vmem:[#allocation4 + $0x40] sm:$0xff] }
  0x16   :  { %v254_v20 = vld [vmem:[%s2039_s2 + $0x48] sm:$0xff]  ;;  %v253_v21 = vld [vmem:[%s2039_s2 + $0x40] sm:$0xff]  ;;  %v91_v22 = vld [vmem:[#allocation4 + $0x38] sm:$0xff]  ;;  %45 = vst.msk [vmem:[#allocation2 + $0x48] sm:$0xff] %vm35_vm0, %v1522_v50 }
  0x17   :  { %272 = vperm.xlu1 %1490, %v248_v11   ;;  %266 = vperm.xlu0 %1489, %v246_v12   ;;  %v256_v23 = vld [vmem:[%s2039_s2 + $0x58] sm:$0xff]  ;;  %v255_v24 = vld [vmem:[%s2039_s2 + $0x50] sm:$0xff]  ;;  %v258_v26 = vld [vmem:[%s2039_s2 + $0x68] sm:$0xff]  ;;  %36 = vst.msk [vmem:[#allocation2] sm:$0xff] %vm35_vm0, %v1522_v50  ;;  %v347_v11 = vadd.s32 24, %v1735_v58 }
  0x18   :  { %1398 = vmatpush3.xpose.msra.mxu0 %v97_v4  ;;  %1467 = vmatpush3.xpose.msra.mxu1 %v97_v4  ;;  %v90_v25 = vld [vmem:[#allocation4 + $0x30] sm:$0xff]  ;;  %v257_v27 = vld [vmem:[%s2039_s2 + $0x60] sm:$0xff]  ;;  %v89_v28 = vld [vmem:[#allocation4 + $0x28] sm:$0xff]  ;;  %37 = vst.msk [vmem:[#allocation2 + $0x8] sm:$0xff] %vm35_vm0, %v1522_v50 }
  0x19   :  { %1399 = vmatprep.subr.mxu0 %v96_v7  ;;  %1452 = vmatprep.subr.mxu1 %v96_v7  ;;  %v260_v29 = vld [vmem:[%s2039_s2 + $0x78] sm:$0xff]  ;;  %v259_v30 = vld [vmem:[%s2039_s2 + $0x70] sm:$0xff]  ;;  %v88_v31 = vld [vmem:[#allocation4 + $0x20] sm:$0xff]  ;;  %38 = vst.msk [vmem:[#allocation2 + $0x10] sm:$0xff] %vm35_vm0, %v1522_v50 }
  0x1a   :  { %v87_v32 = vld [vmem:[#allocation4 + $0x18] sm:$0xff]  ;;  %v86_v33 = vld [vmem:[#allocation4 + $0x10] sm:$0xff]  ;;  %v85_v34 = vld [vmem:[#allocation4 + $0x8] sm:$0xff]  ;;  %39 = vst.msk [vmem:[#allocation2 + $0x18] sm:$0xff] %vm35_vm0, %v1522_v50 }
  0x1b   :  { %278 = vperm.xlu1 %1490, %v250_v14   ;;  %275 = vperm.xlu0 %1489, %v249_v15   ;;  %v84_v35 = vld [vmem:[#allocation4] sm:$0xff]  ;;  %v69_v36 = vld [vmem:[%s2037_s0 + $0x8] sm:$0xff]  ;;  %v70_v38 = vld [vmem:[%s2037_s0 + $0x10] sm:$0xff]  ;;  %40 = vst.msk [vmem:[#allocation2 + $0x20] sm:$0xff] %vm35_vm0, %v1522_v50  ;;  %v352_v15 = vadd.s32 64, %v1735_v58 }
  0x1c   :  { %1400 = vmatpush3.xpose.msra.mxu0 %v96_v7  ;;  %1468 = vmatpush3.xpose.msra.mxu1 %v96_v7  ;;  %v77_v37 = vld [vmem:[%s2037_s0 + $0x48] sm:$0xff]  ;;  %v78_v39 = vld [vmem:[%s2037_s0 + $0x50] sm:$0xff]  ;;  %v71_v40 = vld [vmem:[%s2037_s0 + $0x18] sm:$0xff]  ;;  %41 = vst.msk [vmem:[#allocation2 + $0x28] sm:$0xff] %vm35_vm0, %v1522_v50 }
  0x1d   :  { %1401 = vmatprep.subr.mxu0 %v95_v10  ;;  %1453 = vmatprep.subr.mxu1 %v95_v10  ;;  %v79_v41 = vld [vmem:[%s2037_s0 + $0x58] sm:$0xff]  ;;  %v72_v42 = vld [vmem:[%s2037_s0 + $0x20] sm:$0xff]  ;;  %v73_v44 = vld [vmem:[%s2037_s0 + $0x28] sm:$0xff]  ;;  %42 = vst.msk [vmem:[#allocation2 + $0x30] sm:$0xff] %vm35_vm0, %v1522_v50 }
  0x1e   :  { %v80_v43 = vld [vmem:[%s2037_s0 + $0x60] sm:$0xff]  ;;  %v81_v45 = vld [vmem:[%s2037_s0 + $0x68] sm:$0xff]  ;;  %v74_v46 = vld [vmem:[%s2037_s0 + $0x30] sm:$0xff]  ;;  %43 = vst.msk [vmem:[#allocation2 + $0x38] sm:$0xff] %vm35_vm0, %v1522_v50 }
  0x1f   :  { %284 = vperm.xlu1 %1490, %v252_v17   ;;  %281 = vperm.xlu0 %1489, %v251_v18   ;;  %v82_v47 = vld [vmem:[%s2037_s0 + $0x70] sm:$0xff]  ;;  %v75_v48 = vld [vmem:[%s2037_s0 + $0x38] sm:$0xff]  ;;  %44 = vst.msk [vmem:[#allocation2 + $0x40] sm:$0xff] %vm35_vm0, %v1522_v50  ;;  %46 = vst.msk [vmem:[#allocation2 + $0x50] sm:$0xff] %vm35_vm0, %v1522_v50 }
  0x20   :  { %1402 = vmatpush3.xpose.msra.mxu0 %v95_v10  ;;  %1469 = vmatpush3.xpose.msra.mxu1 %v95_v10  ;;  %v83_v49 = vld [vmem:[%s2037_s0 + $0x78] sm:$0xff]  ;;  %47 = vst.msk [vmem:[#allocation2 + $0x58] sm:$0xff] %vm35_vm0, %v1522_v50  ;;  %48 = vst.msk [vmem:[#allocation2 + $0x60] sm:$0xff] %vm35_vm0, %v1522_v50  ;;  %v1743_v61 = vld [vmem:[%s2040_s3] ss:$0 sm:$0xff] }
  0x21   :  { %1403 = vmatprep.subr.mxu0 %v94_v13  ;;  %1454 = vmatprep.subr.mxu1 %v94_v13  ;;  %49 = vst.msk [vmem:[#allocation2 + $0x68] sm:$0xff] %vm35_vm0, %v1522_v50  ;;  %50 = vst.msk [vmem:[#allocation2 + $0x70] sm:$0xff] %vm35_vm0, %v1522_v50 }
  0x22   :  { %51 = vst.msk [vmem:[#allocation2 + $0x78] sm:$0xff] %vm35_vm0, %v1522_v50  ;;  %v348_v50 = vadd.s32 32, %v1735_v58 }
  0x23   :  { %290 = vperm.xlu1 %1490, %v254_v20   ;;  %287 = vperm.xlu0 %1489, %v253_v21  }
  0x24   :  { %1404 = vmatpush3.xpose.msra.mxu0 %v94_v13  ;;  %1470 = vmatpush3.xpose.msra.mxu1 %v94_v13 }
  0x25   :  { %1405 = vmatprep.subr.mxu0 %v93_v16  ;;  %1455 = vmatprep.subr.mxu1 %v93_v16 }
  0x27   :  { %296 = vperm.xlu1 %1490, %v256_v23   ;;  %293 = vperm.xlu0 %1489, %v255_v24  }
  0x28   :  { %1406 = vmatpush3.xpose.msra.mxu0 %v93_v16  ;;  %1471 = vmatpush3.xpose.msra.mxu1 %v93_v16  ;;  %v355_v16 = vadd.s32 88, %v1735_v58 }
  0x29   :  { %1407 = vmatprep.subr.mxu0 %v92_v19  ;;  %1456 = vmatprep.subr.mxu1 %v92_v19 }
  0x2b   :  { %302 = vperm.xlu1 %1490, %v258_v26   ;;  %299 = vperm.xlu0 %1489, %v257_v27  }
  0x2c   :  { %1408 = vmatpush3.xpose.msra.mxu0 %v92_v19  ;;  %1472 = vmatpush3.xpose.msra.mxu1 %v92_v19  ;;  %v1524_v19 = vmov -inf  }
  0x2d   :  { %1409 = vmatprep.subr.mxu0 %v91_v22  ;;  %1457 = vmatprep.subr.mxu1 %v91_v22  ;;  %53 = vst.msk [vmem:[#allocation3 + $0x8] sm:$0xff] %vm35_vm0, %v1524_v19  ;;  %52 = vst.msk [vmem:[#allocation3] sm:$0xff] %vm35_vm0, %v1524_v19 }
  0x2e   :  { %54 = vst.msk [vmem:[#allocation3 + $0x10] sm:$0xff] %vm35_vm0, %v1524_v19  ;;  %55 = vst.msk [vmem:[#allocation3 + $0x18] sm:$0xff] %vm35_vm0, %v1524_v19 }
  0x2f   :  { %308 = vperm.xlu1 %1490, %v260_v29   ;;  %305 = vperm.xlu0 %1489, %v259_v30   ;;  %56 = vst.msk [vmem:[#allocation3 + $0x20] sm:$0xff] %vm35_vm0, %v1524_v19  ;;  %57 = vst.msk [vmem:[#allocation3 + $0x28] sm:$0xff] %vm35_vm0, %v1524_v19  ;;  %v346_v30 = vadd.s32 16, %v1735_v58 }
  0x30   :  { %1410 = vmatpush3.xpose.msra.mxu0 %v91_v22  ;;  %1473 = vmatpush3.xpose.msra.mxu1 %v91_v22  ;;  %58 = vst.msk [vmem:[#allocation3 + $0x30] sm:$0xff] %vm35_vm0, %v1524_v19  ;;  %59 = vst.msk [vmem:[#allocation3 + $0x38] sm:$0xff] %vm35_vm0, %v1524_v19 }
  0x31   :  { %1411 = vmatprep.subr.mxu0 %v90_v25  ;;  %1458 = vmatprep.subr.mxu1 %v90_v25  ;;  %60 = vst.msk [vmem:[#allocation3 + $0x40] sm:$0xff] %vm35_vm0, %v1524_v19  ;;  %61 = vst.msk [vmem:[#allocation3 + $0x48] sm:$0xff] %vm35_vm0, %v1524_v19 }
  0x32   :  { %62 = vst.msk [vmem:[#allocation3 + $0x50] sm:$0xff] %vm35_vm0, %v1524_v19  ;;  %63 = vst.msk [vmem:[#allocation3 + $0x58] sm:$0xff] %vm35_vm0, %v1524_v19 }
  0x33   :  { %64 = vst.msk [vmem:[#allocation3 + $0x60] sm:$0xff] %vm35_vm0, %v1524_v19  ;;  %65 = vst.msk [vmem:[#allocation3 + $0x68] sm:$0xff] %vm35_vm0, %v1524_v19 }
  0x34   :  { %1412 = vmatpush3.xpose.msra.mxu0 %v90_v25  ;;  %1474 = vmatpush3.xpose.msra.mxu1 %v90_v25  ;;  %66 = vst.msk [vmem:[#allocation3 + $0x70] sm:$0xff] %vm35_vm0, %v1524_v19  ;;  %67 = vst.msk [vmem:[#allocation3 + $0x78] sm:$0xff] %vm35_vm0, %v1524_v19  ;;  %v546_v22 = vld [vmem:[#allocation3 + $0x8] sm:$0xff] }
  0x35   :  { %1413 = vmatprep.subr.mxu0 %v89_v28  ;;  %1459 = vmatprep.subr.mxu1 %v89_v28 }
  0x38   :  { %1414 = vmatpush3.xpose.msra.mxu0 %v89_v28  ;;  %1475 = vmatpush3.xpose.msra.mxu1 %v89_v28 }
  0x39   :  { %1415 = vmatprep.subr.mxu0 %v88_v31  ;;  %1460 = vmatprep.subr.mxu1 %v88_v31 }
  0x3c   :  { %1416 = vmatpush3.xpose.msra.mxu0 %v88_v31  ;;  %1476 = vmatpush3.xpose.msra.mxu1 %v88_v31 }
  0x3d   :  { %1417 = vmatprep.subr.mxu0 %v87_v32  ;;  %1461 = vmatprep.subr.mxu1 %v87_v32 }
  0x40   :  { %1418 = vmatpush3.xpose.msra.mxu0 %v87_v32  ;;  %1477 = vmatpush3.xpose.msra.mxu1 %v87_v32 }
  0x41   :  { %1419 = vmatprep.subr.mxu0 %v86_v33  ;;  %1462 = vmatprep.subr.mxu1 %v86_v33 }
  0x44   :  { %1420 = vmatpush3.xpose.msra.mxu0 %v86_v33  ;;  %1478 = vmatpush3.xpose.msra.mxu1 %v86_v33  ;;  %v349_v33 = vadd.s32 40, %v1735_v58 }
  0x45   :  { %1421 = vmatprep.subr.mxu0 %v85_v34  ;;  %1463 = vmatprep.subr.mxu1 %v85_v34 }
  0x48   :  { %1422 = vmatpush3.xpose.msra.mxu0 %v85_v34  ;;  %1479 = vmatpush3.xpose.msra.mxu1 %v85_v34 }
  0x49   :  { %1423 = vmatprep.subr.mxu0 %v84_v35  ;;  %1464 = vmatprep.subr.mxu1 %v84_v35 }
  0x4c   :  { %1424 = vmatpush3.xpose.msra.mxu0 %v84_v35  ;;  %1480 = vmatpush3.xpose.msra.mxu1 %v84_v35  ;;  %v354_v35 = vadd.s32 80, %v1735_v58 }
  0x4f   :  { %1426 = vmatmul.mubr.f32.vlgmr.msra.gmra.mxu0 %v69_v36  ;;  %1438 = vmatmul.mubr.f32.vlgmr.msra.gmra.mxu1 %v77_v37  ;;  %v357_v36 = vadd.s32 104, %v1735_v58 }
  0x50   :  { %1428 = vmatprep.mubr.f32.mxu0 %v70_v38  ;;  %1440 = vmatprep.mubr.f32.mxu1 %v78_v39 }
  0x53   :  { %1429 = vmatmul.mubr.f32.gmra.mxu0 %v71_v40  ;;  %1441 = vmatmul.mubr.f32.gmra.mxu1 %v79_v41 }
  0x54   :  { %1431 = vmatprep.mubr.f32.mxu0 %v72_v42  ;;  %1443 = vmatprep.mubr.f32.mxu1 %v80_v43 }
  0x57   :  { %1432 = vmatmul.mubr.f32.gmra.mxu0 %v73_v44  ;;  %1444 = vmatmul.mubr.f32.gmra.mxu1 %v81_v45 }
  0x58   :  { %1434 = vmatprep.mubr.f32.mxu0 %v74_v46  ;;  %1446 = vmatprep.mubr.f32.mxu1 %v82_v47 }
  0x5b   :  { %1435 = vmatmul.mubr.f32.gmra.mxu0 %v75_v48  ;;  %1447 = vmatmul.mubr.f32.gmra.mxu1 %v83_v49  ;;  %v547_v48 = vld [vmem:[#allocation3 + $0x10] sm:$0xff] }
  0x8e   :  { %v1725_v51 = vpop.permute.xlu1 %269  ;;  %v1727_v52 = vpop.permute.xlu0 %263 }
  0x8f   :  { %vm314_vm1 = vcmp.eq.s32.totalorder %v1727_v52, %v1743_v61 }
  0x90   :  { %vm1758_vm5 = vmxor %vm314_vm1, %vm1523_vm4 }
  0x91   :  { %vm432_vm13 = vmand %vm1758_vm5, %vm429_vm11 }
  0x92   :  { %v1729_v53 = vpop.permute.xlu1 %272  ;;  %v267_v54 = vpop.permute.xlu0 %266 }
  0x93   :  { %vm315_vm2 = vcmp.eq.s32.totalorder %v267_v54, %v1743_v61 }
  0x94   :  { %vm414_vm8 = vmxor %vm315_vm2, %vm1523_vm4 }
  0x95   :  { %vm398_vm9 = vmand %vm315_vm2, %vm382_vm3 }
  0x96   :  { %v1731_v55 = vpop.permute.xlu1 %278  ;;  %v1733_v57 = vpop.permute.xlu0 %275  ;;  %vm433_vm14 = vmand %vm414_vm8, %vm429_vm11  ;;  %vm384_vm8 = vcmp.ne.s32.totalorder %v347_v11, %v1746_v63 }
  0x9a   :  { %v1737_v59 = vpop.permute.xlu1 %284  ;;  %v1751_v0 = vpop.permute.xlu0 %281 }
  0x9e   :  { %v291_v1 = vpop.permute.xlu1 %290  ;;  %v288_v5 = vpop.permute.xlu0 %287 }
  0x9f   :  { %vm323_vm6 = vcmp.eq.s32.totalorder %v291_v1, %v1743_v61  ;;  %vm322_vm12 = vcmp.eq.s32.totalorder %v288_v5, %v1743_v61 }
  0xa0   :  { %vm406_vm10 = vmand %vm323_vm6, %vm390_vm7  ;;  %vm317_vm7 = vcmp.eq.s32.totalorder %v1729_v53, %v1743_v61  ;;  %v351_v53 = vadd.s32 56, %v1735_v58 }
  0xa1   :  { %vm422_vm15 = vmxor %vm323_vm6, %vm1523_vm4  ;;  %vm381_vm6 = vcmp.ne.s32.totalorder %v1735_v58, %v1746_v63 }
  0xa2   :  { %vm421_vm2 = vmxor %vm322_vm12, %vm1523_vm4  ;;  %v297_v21 = vpop.permute.xlu1 %296  ;;  %v294_v26 = vpop.permute.xlu0 %293 }
  0xa3   :  { %vm1784_vm3 = vmand %vm422_vm15, %vm429_vm11 }
  0xa4   :  { %vm1790_vm5 = vmand %vm421_vm2, %vm429_vm11  ;;  %vm325_vm2 = vcmp.eq.s32.totalorder %v297_v21, %v1743_v61 }
  0xa6   :  { %v303_v40 = vpop.permute.xlu1 %302  ;;  %v300_v45 = vpop.permute.xlu0 %299 }
  0xaa   :  { %v309_v1 = vpop.permute.xlu1 %308 }
 0x10f   :  { %v1427_v3 = vpop.f32.mrf.mxu0  ;;  %v1439_v4 = vpop.f32.mrf.mxu1 }
 0x110   :  { %v473_v6 = vsel %vm406_vm10, %v1439_v4, inf  ;;  %v465_v7 = vsel %vm398_vm9, %v1427_v3, inf  ;;  %v562_v9 = vsel %vm433_vm14, %v1427_v3, -inf  ;;  %v570_v17 = vsel %vm1784_vm3, %v1439_v4, -inf  ;;  %vm397_vm10 = vmand %vm314_vm1, %vm381_vm6  ;;  %v306_v3 = vpop.permute.xlu0 %305 }
 0x111   :  { %498 = vmin.xlane.f32.xlu1 %v473_v6  ;;  %482 = vmin.xlane.f32.xlu0 %v465_v7  ;;  %v166_v8 = vpop.f32.mrf.mxu0  ;;  %v206_v12 = vpop.f32.mrf.mxu1  ;;  %vm316_vm9 = vcmp.eq.s32.totalorder %v1725_v51, %v1743_v61  ;;  %vm389_vm14 = vcmp.ne.s32.totalorder %v352_v15, %v1746_v63  ;;  %vm392_vm1 = vcmp.ne.s32.totalorder %v355_v16, %v1746_v63  ;;  %vm416_vm3 = vmxor %vm317_vm7, %vm1523_vm4  ;;  %v457_v16 = vld [vmem:[#allocation2 + $0x48] sm:$0xff] }
 0x112   :  { %v561_v10 = vsel %vm432_vm13, %v166_v8, -inf  ;;  %v569_v18 = vsel %vm1790_vm5, %v206_v12, -inf  ;;  %vm400_vm13 = vmand %vm317_vm7, %vm384_vm8  ;;  %v464_v23 = vsel %vm397_vm10, %v166_v8, inf  ;;  %vm324_vm8 = vcmp.eq.s32.totalorder %v294_v26, %v1743_v61 }
 0x113   :  { %v1430_v20 = vpop.f32.mrf.mxu0  ;;  %vm1839_vm15 = vmxor %vm316_vm9, %vm1523_vm4  ;;  %v1442_v25 = vpop.f32.mrf.mxu1  ;;  %v350_v8 = vadd.s32 48, %v1735_v58 }
 0x114   :  { %v467_v24 = vsel %vm400_vm13, %v1430_v20, inf  ;;  %vm405_vm5 = vmand %vm322_vm12, %vm389_vm14 }
 0x115   :  { %579 = vmax.xlane.f32.xlu0 %v562_v9  ;;  %577 = vmax.xlane.f32.xlu1 %v561_v10  ;;  %vm408_vm6 = vmand %vm325_vm2, %vm392_vm1  ;;  %v472_v27 = vsel %vm405_vm5, %v206_v12, inf  ;;  %v176_v29 = vpop.f32.mrf.mxu0  ;;  %v216_v34 = vpop.f32.mrf.mxu1  ;;  %vm319_vm1 = vcmp.eq.s32.totalorder %v1731_v55, %v1743_v61  ;;  %v356_v55 = vadd.s32 96, %v1735_v58  ;;  %v358_v12 = vadd.s32 112, %v1735_v58 }
 0x116   :  { %v475_v28 = vsel %vm408_vm6, %v1442_v25, inf  ;;  %vm435_vm7 = vmand %vm416_vm3, %vm429_vm11  ;;  %vm386_vm3 = vcmp.ne.s32.totalorder %v349_v33, %v1746_v63  ;;  %v451_v33 = vld [vmem:[#allocation2 + $0x18] sm:$0xff] }
 0x117   :  { %vm434_vm10 = vmand %vm1839_vm15, %vm429_vm11  ;;  %v564_v31 = vsel %vm435_vm7, %v1430_v20, -inf  ;;  %v1433_v39 = vpop.f32.mrf.mxu0  ;;  %vm391_vm7 = vcmp.ne.s32.totalorder %v354_v35, %v1746_v63  ;;  %v1445_v44 = vpop.f32.mrf.mxu1 }
 0x118   :  { %vm424_vm12 = vmxor %vm325_vm2, %vm1523_vm4  ;;  %v563_v32 = vsel %vm434_vm10, %v176_v29, -inf  ;;  %vm383_vm2 = vcmp.ne.s32.totalorder %v346_v30, %v1746_v63  ;;  %vm327_vm10 = vcmp.eq.s32.totalorder %v303_v40, %v1743_v61  ;;  %v459_v40 = vld [vmem:[#allocation2 + $0x58] sm:$0xff] }
 0x119   :  { %595 = vmax.xlane.f32.xlu0 %v570_v17  ;;  %593 = vmax.xlane.f32.xlu1 %v569_v18  ;;  %vm423_vm13 = vmxor %vm324_vm8, %vm1523_vm4  ;;  %v186_v49 = vpop.f32.mrf.mxu0  ;;  %v226_v54 = vpop.f32.mrf.mxu1  ;;  %v449_v17 = vld [vmem:[#allocation2 + $0x8] sm:$0xff] }
 0x11a   :  { %vm443_vm14 = vmand %vm424_vm12, %vm429_vm11  ;;  %vm394_vm12 = vcmp.ne.s32.totalorder %v357_v36, %v1746_v63 }
 0x11b   :  { %vm442_vm15 = vmand %vm423_vm13, %vm429_vm11  ;;  %v572_v37 = vsel %vm443_vm14, %v1442_v25, -inf  ;;  %v1436_v2 = vpop.f32.mrf.mxu0  ;;  %v1448_v6 = vpop.f32.mrf.mxu1 }
 0x11c   :  { %v571_v38 = vsel %vm442_vm15, %v216_v34, -inf  ;;  %vm399_vm5 = vmand %vm316_vm9, %vm383_vm2  ;;  %vm318_vm9 = vcmp.eq.s32.totalorder %v1733_v57, %v1743_v61  ;;  %v450_v57 = vld [vmem:[#allocation2 + $0x10] sm:$0xff] }
 0x11d   :  { %480 = vmin.xlane.f32.xlu0 %v464_v23  ;;  %486 = vmin.xlane.f32.xlu1 %v467_v24  ;;  %vm402_vm6 = vmand %vm319_vm1, %vm386_vm3  ;;  %v466_v41 = vsel %vm399_vm5, %v176_v29, inf  ;;  %v196_v9 = vpop.f32.mrf.mxu0  ;;  %v236_v13 = vpop.f32.mrf.mxu1  ;;  %v545_v23 = vld [vmem:[#allocation3] sm:$0xff] }
 0x11e   :  { %v469_v42 = vsel %vm402_vm6, %v1433_v39, inf  ;;  %vm1891_vm13 = vmxor %vm319_vm1, %vm1523_vm4 }
 0x11f   :  { %vm407_vm14 = vmand %vm324_vm8, %vm391_vm7  ;;  %vm326_vm8 = vcmp.eq.s32.totalorder %v300_v45, %v1743_v61 }
 0x120   :  { %vm410_vm15 = vmand %vm327_vm10, %vm394_vm12  ;;  %v474_v46 = vsel %vm407_vm14, %v216_v34, inf  ;;  %vm385_vm12 = vcmp.ne.s32.totalorder %v348_v50, %v1746_v63  ;;  %vm388_vm14 = vcmp.ne.s32.totalorder %v351_v53, %v1746_v63 }
 0x121   :  { %496 = vmin.xlane.f32.xlu0 %v472_v27  ;;  %502 = vmin.xlane.f32.xlu1 %v475_v28  ;;  %vm417_vm2 = vmxor %vm318_vm9, %vm1523_vm4  ;;  %v477_v47 = vsel %vm410_vm15, %v1445_v44, inf  ;;  %v553_v27 = vld [vmem:[#allocation3 + $0x40] sm:$0xff] }
 0x122   :  { %vm1908_vm1 = vmxor %vm327_vm10, %vm1523_vm4 }
 0x123   :  { %vm437_vm3 = vmand %vm1891_vm13, %vm429_vm11  ;;  %vm321_vm13 = vcmp.eq.s32.totalorder %v1737_v59, %v1743_v61 }
 0x124   :  { %vm436_vm5 = vmand %vm417_vm2, %vm429_vm11  ;;  %v566_v51 = vsel %vm437_vm3, %v1433_v39, -inf  ;;  %vm329_vm3 = vcmp.eq.s32.totalorder %v309_v1, %v1743_v61  ;;  %v456_v39 = vld [vmem:[#allocation2 + $0x40] sm:$0xff] }
 0x125   :  { %583 = vmax.xlane.f32.xlu0 %v564_v31  ;;  %581 = vmax.xlane.f32.xlu1 %v563_v32  ;;  %vm425_vm6 = vmxor %vm326_vm8, %vm1523_vm4  ;;  %v565_v52 = vsel %vm436_vm5, %v186_v49, -inf  ;;  %vm396_vm5 = vcmp.ne.s32.totalorder %v359_v56, %v1746_v63  ;;  %v448_v32 = vld [vmem:[#allocation2] sm:$0xff]  ;;  %v555_v56 = vld [vmem:[#allocation3 + $0x50] sm:$0xff] }
 0x126   :  { %vm445_vm7 = vmand %vm1908_vm1, %vm429_vm11  ;;  %vm393_vm1 = vcmp.ne.s32.totalorder %v356_v55, %v1746_v63  ;;  %v556_v55 = vld [vmem:[#allocation3 + $0x58] sm:$0xff] }
 0x127   :  { %vm444_vm10 = vmand %vm425_vm6, %vm429_vm11  ;;  %v574_v60 = vsel %vm445_vm7, %v1445_v44, -inf  ;;  %vm328_vm7 = vcmp.eq.s32.totalorder %v306_v3, %v1743_v61 }
 0x128   :  { %v573_v62 = vsel %vm444_vm10, %v226_v54, -inf  ;;  %vm401_vm15 = vmand %vm318_vm9, %vm385_vm12  ;;  %vm320_vm9 = vcmp.eq.s32.totalorder %v1751_v0, %v1743_v61 }
 0x129   :  { %599 = vmax.xlane.f32.xlu0 %v572_v37  ;;  %597 = vmax.xlane.f32.xlu1 %v571_v38  ;;  %vm404_vm2 = vmand %vm321_vm13, %vm388_vm14  ;;  %v468_v4 = vsel %vm401_vm15, %v186_v49, inf }
 0x12a   :  { %v471_v5 = vsel %vm404_vm2, %v1436_v2, inf  ;;  %vm1949_vm6 = vmxor %vm321_vm13, %vm1523_vm4  ;;  %vm387_vm2 = vcmp.ne.s32.totalorder %v350_v8, %v1746_v63 }
 0x12b   :  { %vm409_vm10 = vmand %vm326_vm8, %vm393_vm1 }
 0x12c   :  { %vm412_vm12 = vmand %vm329_vm3, %vm396_vm5  ;;  %v476_v59 = vsel %vm409_vm10, %v226_v54, inf }
 0x12d   :  { %484 = vmin.xlane.f32.xlu0 %v466_v41  ;;  %490 = vmin.xlane.f32.xlu1 %v469_v42  ;;  %vm419_vm13 = vmxor %vm320_vm9, %vm1523_vm4  ;;  %v479_v7 = vsel %vm412_vm12, %v1448_v6, inf }
 0x12e   :  { %vm427_vm14 = vmxor %vm328_vm7, %vm1523_vm4 }
 0x12f   :  { %vm439_vm8 = vmand %vm1949_vm6, %vm429_vm11  ;;  %vm395_vm6 = vcmp.ne.s32.totalorder %v358_v12, %v1746_v63  ;;  %v554_v63 = vld [vmem:[#allocation3 + $0x48] sm:$0xff] }
 0x130   :  { %vm438_vm15 = vmand %vm419_vm13, %vm429_vm11  ;;  %v568_v10 = vsel %vm439_vm8, %v1436_v2, -inf }
 0x131   :  { %500 = vmin.xlane.f32.xlu0 %v474_v46  ;;  %506 = vmin.xlane.f32.xlu1 %v477_v47  ;;  %v567_v11 = vsel %vm438_vm15, %v196_v9, -inf  ;;  %vm446_vm1 = vmand %vm427_vm14, %vm429_vm11  ;;  %v548_v47 = vld [vmem:[#allocation3 + $0x18] sm:$0xff] }
 0x132   :  { %vm403_vm5 = vmand %vm320_vm9, %vm387_vm2  ;;  %v575_v14 = vsel %vm446_vm1, %v236_v13, -inf }
 0x133   :  { %v470_v15 = vsel %vm403_vm5, %v196_v9, inf  ;;  %vm411_vm10 = vmand %vm328_vm7, %vm395_vm6 }
 0x134   :  { %vm428_vm12 = vmxor %vm329_vm3, %vm1523_vm4  ;;  %v478_v58 = vsel %vm411_vm10, %v236_v13, inf }
 0x135   :  { %587 = vmax.xlane.f32.xlu0 %v566_v51  ;;  %585 = vmax.xlane.f32.xlu1 %v565_v52  ;;  %vm447_vm13 = vmand %vm428_vm12, %vm429_vm11 }
 0x136   :  { %v576_v0 = vsel %vm447_vm13, %v1448_v6, -inf  ;;  %v453_v6 = vld [vmem:[#allocation2 + $0x28] sm:$0xff] }
 0x139   :  { %603 = vmax.xlane.f32.xlu0 %v574_v60  ;;  %601 = vmax.xlane.f32.xlu1 %v573_v62 }
 0x13d   :  { %488 = vmin.xlane.f32.xlu0 %v468_v4  ;;  %494 = vmin.xlane.f32.xlu1 %v471_v5 }
 0x141   :  { %504 = vmin.xlane.f32.xlu0 %v476_v59  ;;  %510 = vmin.xlane.f32.xlu1 %v479_v7 }
 0x145   :  { %591 = vmax.xlane.f32.xlu0 %v568_v10  ;;  %589 = vmax.xlane.f32.xlu1 %v567_v11  ;;  %v458_v10 = vld [vmem:[#allocation2 + $0x50] sm:$0xff]  ;;  %v461_v11 = vld [vmem:[#allocation2 + $0x68] sm:$0xff] }
 0x149   :  { %605 = vmax.xlane.f32.xlu1 %v575_v14  ;;  %492 = vmin.xlane.f32.xlu0 %v470_v15 }
 0x14d   :  { %508 = vmin.xlane.f32.xlu0 %v478_v58  ;;  %v550_v58 = vld [vmem:[#allocation3 + $0x28] sm:$0xff] }
 0x151   :  { %607 = vmax.xlane.f32.xlu0 %v576_v0  ;;  %v549_v0 = vld [vmem:[#allocation3 + $0x20] sm:$0xff] }
 0x19a   :  { %v499_v18 = vpop.xlane.xlu1 %498  ;;  %v483_v19 = vpop.xlane.xlu0 %482 }
 0x19b   :  { %v521_v20 = vmin.f32 %v457_v16, %v499_v18  ;;  %v513_v21 = vmin.f32 %v449_v17, %v483_v19 }
 0x19d   :  { %538 = vst.msk [vmem:[#allocation2 + $0x48] sm:$0xff] %vm35_vm0, %v521_v20  ;;  %530 = vst.msk [vmem:[#allocation2 + $0x8] sm:$0xff] %vm35_vm0, %v513_v21  ;;  %v558_v21 = vld [vmem:[#allocation3 + $0x68] sm:$0xff] }
 0x19e   :  { %v580_v61 = vpop.xlane.xlu0 %579  ;;  %v578_v24 = vpop.xlane.xlu1 %577 }
 0x19f   :  { %v610_v25 = vmax.f32 %v546_v22, %v580_v61  ;;  %v609_v26 = vmax.f32 %v545_v23, %v578_v24  ;;  %v557_v22 = vld [vmem:[#allocation3 + $0x60] sm:$0xff] }
 0x1a1   :  { %626 = vst.msk [vmem:[#allocation3 + $0x8] sm:$0xff] %vm35_vm0, %v610_v25  ;;  %625 = vst.msk [vmem:[#allocation3] sm:$0xff] %vm35_vm0, %v609_v26 }
 0x1a2   :  { %v596_v28 = vpop.xlane.xlu0 %595  ;;  %v594_v29 = vpop.xlane.xlu1 %593 }
 0x1a3   :  { %v618_v30 = vmax.f32 %v554_v63, %v596_v28  ;;  %v617_v31 = vmax.f32 %v553_v27, %v594_v29  ;;  %v452_v27 = vld [vmem:[#allocation2 + $0x20] sm:$0xff]  ;;  %v455_v28 = vld [vmem:[#allocation2 + $0x38] sm:$0xff] }
 0x1a5   :  { %634 = vst.msk [vmem:[#allocation3 + $0x48] sm:$0xff] %vm35_vm0, %v618_v30  ;;  %633 = vst.msk [vmem:[#allocation3 + $0x40] sm:$0xff] %vm35_vm0, %v617_v31 }
 0x1a6   :  { %v481_v34 = vpop.xlane.xlu0 %480  ;;  %v487_v35 = vpop.xlane.xlu1 %486 }
 0x1a7   :  { %v512_v36 = vmin.f32 %v448_v32, %v481_v34  ;;  %v515_v37 = vmin.f32 %v451_v33, %v487_v35 }
 0x1a8   :  { %v856_v38 = vld [vmem:[#allocation3] sm:$0xff] }
 0x1a9   :  { %v1064_v41 = vmul.f32 2.0, %v856_v38  ;;  %529 = vst.msk [vmem:[#allocation2] sm:$0xff] %vm35_vm0, %v512_v36  ;;  %532 = vst.msk [vmem:[#allocation2 + $0x18] sm:$0xff] %vm35_vm0, %v515_v37 }
 0x1aa   :  { %v497_v42 = vpop.xlane.xlu0 %496  ;;  %v503_v43 = vpop.xlane.xlu1 %502 }
 0x1ab   :  { %v1080_v44 = vsub.f32 2.0, %v1064_v41  ;;  %v520_v45 = vmin.f32 %v456_v39, %v497_v42  ;;  %v523_v46 = vmin.f32 %v459_v40, %v503_v43  ;;  %v460_v39 = vld [vmem:[#allocation2 + $0x60] sm:$0xff]  ;;  %v463_v40 = vld [vmem:[#allocation2 + $0x78] sm:$0xff] }
 0x1ad   :  { %537 = vst.msk [vmem:[#allocation2 + $0x40] sm:$0xff] %vm35_vm0, %v520_v45  ;;  %540 = vst.msk [vmem:[#allocation2 + $0x58] sm:$0xff] %vm35_vm0, %v523_v46  ;;  %v1999_v49 = vmax.f32 %v1080_v44, 0.0 }
 0x1ae   :  { %v584_v50 = vpop.xlane.xlu0 %583  ;;  %v582_v51 = vpop.xlane.xlu1 %581 }
 0x1af   :  { %v612_v53 = vmax.f32 %v548_v47, %v584_v50  ;;  %v611_v54 = vmax.f32 %v547_v48, %v582_v51  ;;  %1491 = vrsqrt.f32 %v1999_v49  ;;  %vm1114_vm4 = vcmp.eq.f32.partialorder %v1999_v49, inf  ;;  %v552_v50 = vld [vmem:[#allocation3 + $0x38] sm:$0xff]  ;;  %v551_v51 = vld [vmem:[#allocation3 + $0x30] sm:$0xff] }
 0x1b0   :  { %v2001_v52 = vld [vmem:[#allocation2] sm:$0xff]  ;;  %v1117_v32 = vand.u32 2147483648, %v1999_v49  ;;  %vm1116_vm7 = vcmp.eq.f32.partialorder %v1999_v49, 0.0 }
 0x1b1   :  { %v888_v60 = vmul.f32 2.0, %v2001_v52  ;;  %628 = vst.msk [vmem:[#allocation3 + $0x18] sm:$0xff] %vm35_vm0, %v612_v53  ;;  %627 = vst.msk [vmem:[#allocation3 + $0x10] sm:$0xff] %vm35_vm0, %v611_v54  ;;  %vm872_vm9 = vcmp.lt.f32.partialorder %v2001_v52, inf }
 0x1b2   :  { %v600_v62 = vpop.xlane.xlu0 %599  ;;  %v598_v1 = vpop.xlane.xlu1 %597 }
 0x1b3   :  { %v904_v2 = vsub.f32 2.0, %v888_v60  ;;  %v620_v3 = vmax.f32 %v556_v55, %v600_v62  ;;  %v619_v4 = vmax.f32 %v555_v56, %v598_v1  ;;  %v559_v56 = vld [vmem:[#allocation3 + $0x70] sm:$0xff] }
 0x1b4   :  { %v454_v60 = vld [vmem:[#allocation2 + $0x30] sm:$0xff] }
 0x1b5   :  { %v920_v5 = vmax.f32 %v904_v2, 0.0  ;;  %636 = vst.msk [vmem:[#allocation3 + $0x58] sm:$0xff] %vm35_vm0, %v620_v3  ;;  %635 = vst.msk [vmem:[#allocation3 + $0x50] sm:$0xff] %vm35_vm0, %v619_v4  ;;  %v462_v4 = vld [vmem:[#allocation2 + $0x70] sm:$0xff] }
 0x1b6   :  { %v485_v59 = vpop.xlane.xlu0 %484  ;;  %v491_v7 = vpop.xlane.xlu1 %490 }
 0x1b7   :  { %1493 = vrsqrt.f32 %v920_v5  ;;  %v514_v8 = vmin.f32 %v450_v57, %v485_v59  ;;  %v517_v9 = vmin.f32 %v453_v6, %v491_v7  ;;  %vm938_vm11 = vcmp.eq.f32.partialorder %v920_v5, inf  ;;  %v560_v6 = vld [vmem:[#allocation3 + $0x78] sm:$0xff] }
 0x1b8   :  { %v941_v30 = vand.u32 2147483648, %v920_v5  ;;  %vm940_vm3 = vcmp.eq.f32.partialorder %v920_v5, 0.0 }
 0x1b9   :  { %531 = vst.msk [vmem:[#allocation2 + $0x10] sm:$0xff] %vm35_vm0, %v514_v8  ;;  %534 = vst.msk [vmem:[#allocation2 + $0x28] sm:$0xff] %vm35_vm0, %v517_v9 }
 0x1ba   :  { %v501_v12 = vpop.xlane.xlu0 %500  ;;  %v507_v13 = vpop.xlane.xlu1 %506 }
 0x1bb   :  { %v522_v14 = vmin.f32 %v458_v10, %v501_v12  ;;  %v525_v15 = vmin.f32 %v461_v11, %v507_v13 }
 0x1bc   :  { %v1492_v18 = vpop.eup %1491 }
 0x1bd   :  { %539 = vst.msk [vmem:[#allocation2 + $0x50] sm:$0xff] %vm35_vm0, %v522_v14  ;;  %542 = vst.msk [vmem:[#allocation2 + $0x68] sm:$0xff] %vm35_vm0, %v525_v15  ;;  %v1113_v23 = vmul.f32 %v1492_v18, %v1999_v49 }
 0x1be   :  { %v588_v16 = vpop.xlane.xlu0 %587  ;;  %v586_v17 = vpop.xlane.xlu1 %585 }
 0x1bf   :  { %v614_v19 = vmax.f32 %v550_v58, %v588_v16  ;;  %v613_v20 = vmax.f32 %v549_v0, %v586_v17  ;;  %v1115_v31 = vsel %vm1114_vm4, %v1999_v49, %v1113_v23 }
 0x1c0   :  { %v1118_v42 = vsel %vm1116_vm7, %v1117_v32, %v1115_v31 }
 0x1c1   :  { %630 = vst.msk [vmem:[#allocation3 + $0x28] sm:$0xff] %vm35_vm0, %v614_v19  ;;  %629 = vst.msk [vmem:[#allocation3 + $0x20] sm:$0xff] %vm35_vm0, %v613_v20 }
 0x1c2   :  { %v604_v61 = vpop.xlane.xlu0 %603  ;;  %v602_v24 = vpop.xlane.xlu1 %601 }
 0x1c3   :  { %v622_v25 = vmax.f32 %v558_v21, %v604_v61  ;;  %v621_v26 = vmax.f32 %v557_v22, %v602_v24 }
 0x1c4   :  { %v1494_v63 = vpop.eup %1493 }
 0x1c5   :  { %v937_v29 = vmul.f32 %v1494_v63, %v920_v5  ;;  %638 = vst.msk [vmem:[#allocation3 + $0x68] sm:$0xff] %vm35_vm0, %v622_v25  ;;  %637 = vst.msk [vmem:[#allocation3 + $0x60] sm:$0xff] %vm35_vm0, %v621_v26 }
 0x1c6   :  { %v489_v33 = vpop.xlane.xlu0 %488  ;;  %v495_v34 = vpop.xlane.xlu1 %494 }
 0x1c7   :  { %v939_v35 = vsel %vm938_vm11, %v920_v5, %v937_v29  ;;  %v516_v36 = vmin.f32 %v452_v27, %v489_v33  ;;  %v519_v37 = vmin.f32 %v455_v28, %v495_v34 }
 0x1c8   :  { %v942_v38 = vsel %vm940_vm3, %v941_v30, %v939_v35 }
 0x1c9   :  { %v1048_v41 = vsel %vm872_vm9, %v942_v38, -inf  ;;  %533 = vst.msk [vmem:[#allocation2 + $0x20] sm:$0xff] %vm35_vm0, %v516_v36  ;;  %536 = vst.msk [vmem:[#allocation2 + $0x38] sm:$0xff] %vm35_vm0, %v519_v37 }
 0x1ca   :  { %v1224_v43 = vsub.f32 %v1048_v41, %v1118_v42  ;;  %v505_v44 = vpop.xlane.xlu0 %504  ;;  %v511_v45 = vpop.xlane.xlu1 %510 }
 0x1cb   :  { %v524_v46 = vmin.f32 %v460_v39, %v505_v44  ;;  %v527_v47 = vmin.f32 %v463_v40, %v511_v45 }
 0x1cc   :  { %v1240_v48 = vadd.f32 0.3, %v1224_v43 }
 0x1cd   :  { %541 = vst.msk [vmem:[#allocation2 + $0x60] sm:$0xff] %vm35_vm0, %v524_v46  ;;  %544 = vst.msk [vmem:[#allocation2 + $0x78] sm:$0xff] %vm35_vm0, %v527_v47 }
 0x1ce   :  { %v1256_v49 = vmax.f32 %v1240_v48, 0.0  ;;  %v592_v52 = vpop.xlane.xlu0 %591  ;;  %v590_v53 = vpop.xlane.xlu1 %589 }
 0x1cf   :  { %v616_v54 = vmax.f32 %v552_v50, %v592_v52  ;;  %v615_v55 = vmax.f32 %v551_v51, %v590_v53 }
 0x1d0   :  { %1339 = vst.msk [vmem:[%s2041_s4] sm:$0xff] %vm35_vm0, %v1256_v49 }
 0x1d1   :  { %632 = vst.msk [vmem:[#allocation3 + $0x38] sm:$0xff] %vm35_vm0, %v616_v54  ;;  %631 = vst.msk [vmem:[#allocation3 + $0x30] sm:$0xff] %vm35_vm0, %v615_v55 }
 0x1d2   :  { %v606_v62 = vpop.xlane.xlu1 %605  ;;  %v493_v1 = vpop.xlane.xlu0 %492 }
 0x1d3   :  { %v623_v2 = vmax.f32 %v559_v56, %v606_v62  ;;  %v518_v3 = vmin.f32 %v454_v60, %v493_v1 }
 0x1d5   :  { %639 = vst.msk [vmem:[#allocation3 + $0x70] sm:$0xff] %vm35_vm0, %v623_v2  ;;  %535 = vst.msk [vmem:[#allocation2 + $0x30] sm:$0xff] %vm35_vm0, %v518_v3 }
 0x1d6   :  { %v509_v5 = vpop.xlane.xlu0 %508 }
 0x1d7   :  { %v526_v57 = vmin.f32 %v462_v4, %v509_v5 }
 0x1d9   :  { %543 = vst.msk [vmem:[#allocation2 + $0x70] sm:$0xff] %vm35_vm0, %v526_v57 }
 0x1da   :  { %v608_v59 = vpop.xlane.xlu0 %607 }
 0x1db   :  { %v624_v7 = vmax.f32 %v560_v6, %v608_v59 }
 0x1dd   :  { %640 = vst.msk [vmem:[#allocation3 + $0x78] sm:$0xff] %vm35_vm0, %v624_v7 }
 0x1de   :  { %1359 = vsyncpa [#allocation5], 1 }

</bundles_post_ra>
